<compile_context>
chip_gen: v7x
topology: tpu7x:2x2x1
jax: 0.10.0
libtpu: 0.0.40
codegen_flags: <defaults>
</compile_context>

<pallas_src>
import functools

import jax
import jax.numpy as jnp
from jax import lax
from jax.experimental import pallas as pl
from jax.experimental.pallas import tpu as pltpu


_VMEM_BUDGET = 24 << 20     # stay under the 32 MiB scoped-VMEM default (v6e/v7x)
_NEG_INF = -1e30


# ---------------------------------------------------------------- helpers ---

def _round_up(x, m):
    return ((x + m - 1) // m) * m


def _pad2d(x, rows, cols):
    r, c = x.shape
    return jnp.pad(x, ((0, rows - r), (0, cols - c)))


def _masked_log_softmax(logits, num_classes):
    """Stable log_softmax over the lane (class) axis; padded class lanes
    (index >= num_classes) are masked to -1e30 so they don't contribute."""
    lane = lax.broadcasted_iota(jnp.int32, logits.shape, 1)
    masked = jnp.where(lane < num_classes, logits, _NEG_INF)
    m = jnp.max(masked, axis=-1, keepdims=True)                       # XLU
    lse = jnp.log(jnp.sum(jnp.exp(masked - m), axis=-1, keepdims=True))
    return masked - m - lse


# ---------------------------------------------------------------- kernels ---

def _fused_net_kernel(*refs, num_layers, num_classes):
    """Whole GCN stack in one kernel (small problems): adj, x and all weights
    are VMEM-resident.  h_{l+1} = ReLU(adj @ (h_l @ W_l)); final layer linear;
    masked log_softmax epilogue.  Projection-first (associativity reorder) so
    the N x N aggregation always runs on the narrow feature dim."""
    adj_ref, x_ref = refs[0], refs[1]
    w_refs = refs[2:2 + num_layers]
    lp_ref, h_ref = refs[2 + num_layers], refs[3 + num_layers]

    adj = adj_ref[...]                      # bf16 [N_pad, N_pad]
    h = x_ref[...]                          # bf16 [N_pad, F0_pad]
    logits = None
    for li in range(num_layers):
        t = jnp.dot(h, w_refs[li][...], preferred_element_type=jnp.float32)
        z = jnp.dot(adj, t.astype(jnp.bfloat16),
                    preferred_element_type=jnp.float32)
        if li < num_layers - 1:
            h = jnp.maximum(z, 0.0).astype(jnp.bfloat16)
        else:
            logits = z                      # f32 logits
    h_ref[...] = logits
    lp_ref[...] = _masked_log_softmax(logits, num_classes)


def _hidden_layer_kernel(adj_ref, h_ref, w_ref, o_ref, acc_ref):
    """o = ReLU(adj @ (h @ W)), projection fused into the aggregation matmul.

    grid = (row tiles, node-reduction tiles); k is the reduction axis (last).
    W has a constant index_map (VMEM-resident); the k-band of h is projected
    on the fly, so the [N, F_out] intermediate never touches HBM and the
    adjacency is streamed from HBM exactly once per layer."""
    k = pl.program_id(1)

    @pl.when(k == 0)
    def _():
        acc_ref[...] = jnp.zeros_like(acc_ref)

    t = jnp.dot(h_ref[...], w_ref[...], preferred_element_type=jnp.float32)
    acc_ref[...] += jnp.dot(adj_ref[...], t.astype(jnp.bfloat16),
                            preferred_element_type=jnp.float32)

    @pl.when(k == pl.num_programs(1) - 1)
    def _():
        o_ref[...] = jnp.maximum(acc_ref[...], 0.0).astype(o_ref.dtype)


def _final_layer_kernel(adj_ref, h_ref, w_ref, lp_ref, h_out_ref, acc_ref, *,
                        num_classes):
    """Final layer: logits = adj @ (h @ W); masked log_softmax fused into the
    last-K-step epilogue (all f32)."""
    k = pl.program_id(1)

    @pl.when(k == 0)
    def _():
        acc_ref[...] = jnp.zeros_like(acc_ref)

    t = jnp.dot(h_ref[...], w_ref[...], preferred_element_type=jnp.float32)
    acc_ref[...] += jnp.dot(adj_ref[...], t.astype(jnp.bfloat16),
                            preferred_element_type=jnp.float32)

    @pl.when(k == pl.num_programs(1) - 1)
    def _():
        logits = acc_ref[...]
        h_out_ref[...] = logits.astype(h_out_ref.dtype)
        lp_ref[...] = _masked_log_softmax(logits, num_classes).astype(lp_ref.dtype)


# ------------------------------------------------------------ tile logic ----

def _pick_node_tile(n):
    """Square node tile (tm == tk) dividing the padded node count.

    Prefers large multiples of 256 (v6e/v7x MXU is 2x256x256) with bounded
    extra padding, and keeps >= 2 row tiles where possible so the "parallel"
    row axis can shard across v7x's two TensorCores."""
    base = _round_up(n, 128)
    tile, padded = 128, base
    for cand in (1024, 512, 256):
        p = _round_up(n, cand)
        if p - base <= 128:            # at most one extra 128-block of padding
            tile, padded = cand, p
            break
    while tile > 256 and padded // tile < 2:
        tile //= 2
    return tile, padded


def _shrink_tile_for_vmem(tile, n_pad, f_in_pad, f_out_pad):
    """Shrink the node tile until the per-call VMEM footprint fits the budget."""
    def est(t):
        return (2 * t * t * 2                    # adj tile, double-buffered bf16
                + 2 * t * f_in_pad * 2           # h k-band, double-buffered bf16
                + 2 * f_in_pad * f_out_pad * 2   # W, double-buffered bf16
                + 4 * t * f_out_pad * 4          # <=2 f32 outputs, double-buffered
                + t * f_out_pad * 4)             # f32 accumulator scratch
    while tile > 128 and est(tile) > _VMEM_BUDGET and n_pad % (tile // 2) == 0:
        tile //= 2
    return tile


def _fused_net_fits(n_pad, feat_pads):
    """Rough VMEM estimate for the single-call whole-network path."""
    max_f = max(feat_pads)
    bytes_est = (2 * n_pad * n_pad                                   # adj bf16
                 + 2 * n_pad * feat_pads[0]                          # x bf16
                 + sum(2 * a * b for a, b in zip(feat_pads[:-1], feat_pads[1:]))
                 + 4 * n_pad * max_f * 4                             # f32 slack
                 + 2 * 4 * n_pad * feat_pads[-1])                    # f32 outputs
    return bytes_est <= _VMEM_BUDGET


# ----------------------------------------------------------------- driver ---

def _fused_layer(adj_p, h_p, w_p, tile, *, last, num_classes):
    """One GCN layer as a single pallas_call (projection fused into the
    aggregation); grid = (N_pad/tile rows  x  N_pad/tile node-reduction)."""
    n_pad = adj_p.shape[0]
    f_in_pad = h_p.shape[1]
    f_out_pad = w_p.shape[1]
    grid = (n_pad // tile, n_pad // tile)

    in_specs = [
        pl.BlockSpec((tile, tile), lambda i, k: (i, k)),            # adj tile
        pl.BlockSpec((tile, f_in_pad), lambda i, k: (k, 0)),        # h k-band
        pl.BlockSpec((f_in_pad, f_out_pad), lambda i, k: (0, 0)),   # W resident
    ]
    # TODO(synk): for very large class counts, tile the class dim with an
    # online logsumexp instead of one (tile, C_pad) f32 accumulator (v7x VMEM).
    if last:
        out_shape = (jax.ShapeDtypeStruct((n_pad, f_out_pad), jnp.float32),
                     jax.ShapeDtypeStruct((n_pad, f_out_pad), jnp.float32))
        out_specs = (pl.BlockSpec((tile, f_out_pad), lambda i, k: (i, 0)),
                     pl.BlockSpec((tile, f_out_pad), lambda i, k: (i, 0)))
        kernel = functools.partial(_final_layer_kernel, num_classes=num_classes)
    else:
        out_shape = jax.ShapeDtypeStruct((n_pad, f_out_pad), jnp.bfloat16)
        out_specs = pl.BlockSpec((tile, f_out_pad), lambda i, k: (i, 0))
        kernel = _hidden_layer_kernel

    return pl.pallas_call(
        kernel,
        out_shape=out_shape,
        grid_spec=pltpu.PrefetchScalarGridSpec(
            num_scalar_prefetch=0,
            grid=grid,
            in_specs=in_specs,
            out_specs=out_specs,
            scratch_shapes=[pltpu.VMEM((tile, f_out_pad), jnp.float32)],
        ),
        compiler_params=pltpu.CompilerParams(
            dimension_semantics=("parallel", "arbitrary")),
    )(adj_p, h_p, w_p)


@functools.partial(jax.jit, static_argnames=("num_classes", "force_tiled"))
def base_forward(x, adj, weights, *, num_classes, force_tiled=False):
    """BASE.forward: (log_softmax(GNN(x, adj), axis=1), GNN(x, adj)).

    Everything (bf16 cast -> pad -> pallas_call(s) -> slice) lives inside this
    jit so there is no eager f32 pad/cast traffic or per-op dispatch overhead.
    Note: the bf16 adjacency/weights trade ~1e-2 relative error for bandwidth;
    results match an f32 reference at ~1e-1 tolerance.
    """
    n, _ = x.shape
    num_layers = len(weights)
    dims = [x.shape[1]] + [int(w.shape[1]) for w in weights]
    feat_pads = [_round_up(d, 128) for d in dims]

    if not force_tiled and _fused_net_fits(_round_up(n, 128), feat_pads):
        # -------- small problems: the whole network in ONE pallas_call -------
        n_pad = _round_up(n, 128)
        adj_p = _pad2d(adj.astype(jnp.bfloat16), n_pad, n_pad)
        h0 = _pad2d(x.astype(jnp.bfloat16), n_pad, feat_pads[0])
        w_ps = [_pad2d(w.astype(jnp.bfloat16), feat_pads[i], feat_pads[i + 1])
                for i, w in enumerate(weights)]
        kernel = functools.partial(_fused_net_kernel, num_layers=num_layers,
                                   num_classes=num_classes)
        vmem = pl.BlockSpec(memory_space=pltpu.MemorySpace.VMEM)
        lp, h_out = pl.pallas_call(
            kernel,
            out_shape=(jax.ShapeDtypeStruct((n_pad, feat_pads[-1]), jnp.float32),
                       jax.ShapeDtypeStruct((n_pad, feat_pads[-1]), jnp.float32)),
            in_specs=[vmem] * (2 + num_layers),
            out_specs=(vmem, vmem),
        )(adj_p, h0, *w_ps)
        return lp[:n, :num_classes], h_out[:n, :num_classes]

    # ------------ large problems: one fused pallas_call per layer ------------
    tile, n_pad = _pick_node_tile(n)
    tile = _shrink_tile_for_vmem(tile, n_pad,
                                 max(feat_pads[:-1]), max(feat_pads[1:]))
    adj_p = _pad2d(adj.astype(jnp.bfloat16), n_pad, n_pad)
    h = _pad2d(x.astype(jnp.bfloat16), n_pad, feat_pads[0])
    for li, w in enumerate(weights):
        w_p = _pad2d(w.astype(jnp.bfloat16), feat_pads[li], feat_pads[li + 1])
        last = li == num_layers - 1
        res = _fused_layer(adj_p, h, w_p, tile, last=last,
                           num_classes=num_classes)
        if last:
            lp, h_out = res
            return lp[:n, :num_classes], h_out[:n, :num_classes]
        h = res


# ------------------------------------------------------------- reference ----

def _reference(x, adj, weights):
    h = x
    for i, w in enumerate(weights):
        h = adj @ (h @ w)
        if i < len(weights) - 1:
            h = jax.nn.relu(h)
    return jax.nn.log_softmax(h, axis=1), h


# ----------------------------------------------------------------- main -----

if __name__ == "__main__":
    key = jax.random.PRNGKey(0)

    N, F_IN, HIDDEN, C = 64, 32, (32, 16), 7
    dims = (F_IN,) + HIDDEN + (C,)

    keys = jax.random.split(key, 2 + len(dims) - 1)
    x = jax.random.normal(keys[0], (N, F_IN), jnp.float32)

    # random row-normalized adjacency with self-loops
    a = (jax.random.uniform(keys[1], (N, N)) < 0.1).astype(jnp.float32)
    a = jnp.minimum(a + jnp.eye(N, dtype=jnp.float32), 1.0)
    adj = a / jnp.sum(a, axis=1, keepdims=True)

    weights = [
        jax.random.normal(keys[2 + i], (dims[i], dims[i + 1]), jnp.float32)
        / jnp.sqrt(dims[i])
        for i in range(len(dims) - 1)
    ]

    ref_lp, ref_h = _reference(x, adj, weights)

    # (a) small-problem path: whole network in a single pallas_call
    logprobs, h_logits = base_forward(x, adj, weights, num_classes=C)
    jax.block_until_ready((logprobs, h_logits))

    assert logprobs.shape == (N, C) and h_logits.shape == (N, C)
    assert bool(jnp.all(jnp.isfinite(logprobs)))
    assert bool(jnp.all(jnp.isfinite(h_logits)))
    assert bool(jnp.allclose(jnp.sum(jnp.exp(logprobs), axis=1), 1.0, atol=1e-3))
    # loose tolerance: bf16 MXU inputs with f32 accumulation
    assert bool(jnp.allclose(h_logits, ref_h, atol=1e-1, rtol=1e-1))
    assert bool(jnp.allclose(logprobs, ref_lp, atol=1e-1, rtol=1e-1))

    # (b) force the tiled per-layer path (structure used for large graphs)
    lp2, h2 = base_forward(x, adj, weights, num_classes=C, force_tiled=True)
    jax.block_until_ready((lp2, h2))
    assert lp2.shape == (N, C) and h2.shape == (N, C)
    assert bool(jnp.all(jnp.isfinite(lp2)))
    assert bool(jnp.allclose(jnp.sum(jnp.exp(lp2), axis=1), 1.0, atol=1e-3))
    assert bool(jnp.allclose(h2, ref_h, atol=1e-1, rtol=1e-1))
    assert bool(jnp.allclose(lp2, ref_lp, atol=1e-1, rtol=1e-1))

    print("KERNEL_OK")
</pallas_src>

<mosaic_0001>
module attributes {stable_mosaic.version = 11 : i64} {
  func.func @_fused_net_kernel(%arg0: memref<128x128xbf16, #tpu.memory_space<vmem>>, %arg1: memref<128x128xbf16, #tpu.memory_space<vmem>>, %arg2: memref<128x128xbf16, #tpu.memory_space<vmem>>, %arg3: memref<128x128xbf16, #tpu.memory_space<vmem>>, %arg4: memref<128x128xbf16, #tpu.memory_space<vmem>>, %arg5: memref<128x128xf32, #tpu.memory_space<vmem>>, %arg6: memref<128x128xf32, #tpu.memory_space<vmem>>) attributes {dimension_semantics = [], scalar_prefetch = 0 : i64, scratch_operands = 0 : i64, tpu.core_type = #tpu.core_type<tc>} {
    %c0 = arith.constant 0 : index
    %c0_0 = arith.constant 0 : index
    %0 = vector.load %arg0[%c0, %c0_0] : memref<128x128xbf16, #tpu.memory_space<vmem>>, vector<128x128xbf16>
    %c0_1 = arith.constant 0 : index
    %c0_2 = arith.constant 0 : index
    %1 = vector.load %arg1[%c0_1, %c0_2] : memref<128x128xbf16, #tpu.memory_space<vmem>>, vector<128x128xbf16>
    %c0_3 = arith.constant 0 : index
    %c0_4 = arith.constant 0 : index
    %2 = vector.load %arg2[%c0_3, %c0_4] : memref<128x128xbf16, #tpu.memory_space<vmem>>, vector<128x128xbf16>
    %cst = arith.constant dense<0.000000e+00> : vector<128x128xf32>
    %3 = tpu.matmul %1, %2, %cst {dimension_numbers = #tpu.dot_dimension_numbers<[1], [0], [0], [1], [0, 0, 1, 1], [], []>} : vector<128x128xbf16>, vector<128x128xbf16>, vector<128x128xf32> -> vector<128x128xf32>
    %4 = arith.truncf %3 : vector<128x128xf32> to vector<128x128xbf16>
    %cst_5 = arith.constant dense<0.000000e+00> : vector<128x128xf32>
    %5 = tpu.matmul %0, %4, %cst_5 {dimension_numbers = #tpu.dot_dimension_numbers<[1], [0], [0], [1], [0, 0, 1, 1], [], []>} : vector<128x128xbf16>, vector<128x128xbf16>, vector<128x128xf32> -> vector<128x128xf32>
    %cst_6 = arith.constant 0.000000e+00 : f32
    %6 = vector.broadcast %cst_6 : f32 to vector<128x128xf32>
    %7 = arith.maximumf %5, %6 : vector<128x128xf32>
    %8 = arith.truncf %7 : vector<128x128xf32> to vector<128x128xbf16>
    %c0_7 = arith.constant 0 : index
    %c0_8 = arith.constant 0 : index
    %9 = vector.load %arg3[%c0_7, %c0_8] : memref<128x128xbf16, #tpu.memory_space<vmem>>, vector<128x128xbf16>
    %cst_9 = arith.constant dense<0.000000e+00> : vector<128x128xf32>
    %10 = tpu.matmul %8, %9, %cst_9 {dimension_numbers = #tpu.dot_dimension_numbers<[1], [0], [0], [1], [0, 0, 1, 1], [], []>} : vector<128x128xbf16>, vector<128x128xbf16>, vector<128x128xf32> -> vector<128x128xf32>
    %11 = arith.truncf %10 : vector<128x128xf32> to vector<128x128xbf16>
    %cst_10 = arith.constant dense<0.000000e+00> : vector<128x128xf32>
    %12 = tpu.matmul %0, %11, %cst_10 {dimension_numbers = #tpu.dot_dimension_numbers<[1], [0], [0], [1], [0, 0, 1, 1], [], []>} : vector<128x128xbf16>, vector<128x128xbf16>, vector<128x128xf32> -> vector<128x128xf32>
    %cst_11 = arith.constant 0.000000e+00 : f32
    %13 = vector.broadcast %cst_11 : f32 to vector<128x128xf32>
    %14 = arith.maximumf %12, %13 : vector<128x128xf32>
    %15 = arith.truncf %14 : vector<128x128xf32> to vector<128x128xbf16>
    %c0_12 = arith.constant 0 : index
    %c0_13 = arith.constant 0 : index
    %16 = vector.load %arg4[%c0_12, %c0_13] : memref<128x128xbf16, #tpu.memory_space<vmem>>, vector<128x128xbf16>
    %cst_14 = arith.constant dense<0.000000e+00> : vector<128x128xf32>
    %17 = tpu.matmul %15, %16, %cst_14 {dimension_numbers = #tpu.dot_dimension_numbers<[1], [0], [0], [1], [0, 0, 1, 1], [], []>} : vector<128x128xbf16>, vector<128x128xbf16>, vector<128x128xf32> -> vector<128x128xf32>
    %18 = arith.truncf %17 : vector<128x128xf32> to vector<128x128xbf16>
    %cst_15 = arith.constant dense<0.000000e+00> : vector<128x128xf32>
    %19 = tpu.matmul %0, %18, %cst_15 {dimension_numbers = #tpu.dot_dimension_numbers<[1], [0], [0], [1], [0, 0, 1, 1], [], []>} : vector<128x128xbf16>, vector<128x128xbf16>, vector<128x128xf32> -> vector<128x128xf32>
    %c0_16 = arith.constant 0 : index
    %c0_17 = arith.constant 0 : index
    %20 = vector.load %arg6[%c0_16, %c0_17] : memref<128x128xf32, #tpu.memory_space<vmem>>, vector<128x128xf32>
    tpu.vector_store %arg6[%c0_16, %c0_17], %19 {strides = array<i32>} : memref<128x128xf32, #tpu.memory_space<vmem>>, vector<128x128xf32>,
    %21 = tpu.iota {dimensions = array<i32: 1>} : vector<128x128xi32>
    %c7_i32 = arith.constant 7 : i32
    %22 = vector.broadcast %c7_i32 : i32 to vector<128x128xi32>
    %23 = arith.cmpi slt, %21, %22 : vector<128x128xi32>
    %cst_18 = arith.constant -1.000000e+30 : f32
    %24 = vector.broadcast %cst_18 : f32 to vector<128x128xf32>
    %25 = arith.select %23, %19, %24 : vector<128x128xi1>, vector<128x128xf32>
    %cst_19 = arith.constant dense<0xFF800000> : vector<128xf32>
    %26 = vector.multi_reduction <maximumf>, %25, %cst_19 [1] : vector<128x128xf32> to vector<128xf32>
    %27 = vector.shape_cast %26 : vector<128xf32> to vector<128x1xf32>
    %28 = vector.broadcast %27 : vector<128x1xf32> to vector<128x128xf32>
    %29 = arith.subf %25, %28 : vector<128x128xf32>
    %30 = math.exp %29 : vector<128x128xf32>
    %cst_20 = arith.constant dense<0.000000e+00> : vector<128xf32>
    %31 = vector.multi_reduction <add>, %30, %cst_20 [1] : vector<128x128xf32> to vector<128xf32>
    %32 = vector.shape_cast %31 : vector<128xf32> to vector<128x1xf32>
    %33 = math.log %32 : vector<128x1xf32>
    %34 = vector.broadcast %27 : vector<128x1xf32> to vector<128x128xf32>
    %35 = arith.subf %25, %34 : vector<128x128xf32>
    %36 = vector.broadcast %33 : vector<128x1xf32> to vector<128x128xf32>
    %37 = arith.subf %35, %36 : vector<128x128xf32>
    %c0_21 = arith.constant 0 : index
    %c0_22 = arith.constant 0 : index
    %38 = vector.load %arg5[%c0_21, %c0_22] : memref<128x128xf32, #tpu.memory_space<vmem>>, vector<128x128xf32>
    tpu.vector_store %arg5[%c0_21, %c0_22], %37 {strides = array<i32>} : memref<128x128xf32, #tpu.memory_space<vmem>>, vector<128x128xf32>,
    return
  }
}

</mosaic_0001>

<bundles_post_ra>
// kernel: base_forward.1
= control target key start
LH: loop header
LB: loop body
LE: loop exit
PB: predicated region body
PF: predicated region fallthrough
CT: control target
= control target key end

     0   :  { %s2066_s2 = inlined_call_operand.vmem [shape: bf16[128,128], index: 2, kind: input, shape index: {}]   ;;  %s2067_s1 = inlined_call_operand.vmem [shape: bf16[128,128], index: 1, kind: input, shape index: {}]   ;;  %s2068_s0 = inlined_call_operand.vmem [shape: bf16[128,128], index: 0, kind: input, shape index: {}]   ;;  %s2069_s3 = inlined_call_operand.vmem [shape: bf16[128,128], index: 3, kind: input, shape index: {}]   ;;  %s2070_s4 = inlined_call_operand.vmem [shape: bf16[128,128], index: 4, kind: input, shape index: {}]   ;;  %s2071_s6 = inlined_call_operand.vmem [shape: f32[128,128], index: 6, kind: output, shape index: {1}]   ;;  %s2072_s5 = inlined_call_operand.vmem [shape: f32[128,128], index: 5, kind: output, shape index: {0}]  }
   0x1   :  { %v1544_v0 = vld [vmem:[%s2066_s2] sm:$0xff]   ;;  %v1545_v1 = vld [vmem:[%s2066_s2 + $0x8] sm:$0xff]   ;;  %v1546_v2 = vld [vmem:[%s2066_s2 + $0x10] sm:$0xff]  }
   0x2   :  { %1352 = vmatprep.subr.bf16.mxu0 %v1544_v0  ;;  %v1547_v3 = vld [vmem:[%s2066_s2 + $0x18] sm:$0xff]   ;;  %v1552_v4 = vld [vmem:[%s2067_s1] sm:$0xff]   ;;  %v1549_v6 = vld [vmem:[%s2066_s2 + $0x28] sm:$0xff]  }
   0x3   :  { %1353 = vmatpush3.bf16.msra.mxu0 %v1544_v0  ;;  %1368 = vmatprep.mubr.bf16.mxu0 %v1552_v4  ;;  %v1548_v5 = vld [vmem:[%s2066_s2 + $0x20] sm:$0xff]   ;;  %v1550_v7 = vld [vmem:[%s2066_s2 + $0x30] sm:$0xff]   ;;  %v1551_v8 = vld [vmem:[%s2066_s2 + $0x38] sm:$0xff]  }
   0x4   :  { %1354 = vmatprep.subr.bf16.mxu0 %v1545_v1  ;;  %v1553_v9 = vld [vmem:[%s2067_s1 + $0x8] sm:$0xff]   ;;  %v1554_v10 = vld [vmem:[%s2067_s1 + $0x10] sm:$0xff]   ;;  %v1555_v11 = vld [vmem:[%s2067_s1 + $0x18] sm:$0xff]  }
   0x5   :  { %v1556_v12 = vld [vmem:[%s2067_s1 + $0x20] sm:$0xff]   ;;  %v1557_v13 = vld [vmem:[%s2067_s1 + $0x28] sm:$0xff]   ;;  %v1558_v14 = vld [vmem:[%s2067_s1 + $0x30] sm:$0xff]  }
   0x6   :  { %v1559_v15 = vld [vmem:[%s2067_s1 + $0x38] sm:$0xff]   ;;  %v1734_v16 = vld [vmem:[%s2068_s0] sm:$0xff]   ;;  %v1569_v18 = vld [vmem:[%s2069_s3 + $0x8] sm:$0xff]  }
   0x7   :  { %1355 = vmatpush3.bf16.msra.mxu0 %v1545_v1  ;;  %1400 = vmatprep.mubr.bf16.mxu1 %v1734_v16  ;;  %v1568_v17 = vld [vmem:[%s2069_s3] sm:$0xff]   ;;  %v1570_v19 = vld [vmem:[%s2069_s3 + $0x10] sm:$0xff]   ;;  %v1571_v20 = vld [vmem:[%s2069_s3 + $0x18] sm:$0xff]  }
   0x8   :  { %1356 = vmatprep.subr.bf16.mxu0 %v1546_v2  ;;  %v1572_v21 = vld [vmem:[%s2069_s3 + $0x20] sm:$0xff]   ;;  %v1573_v22 = vld [vmem:[%s2069_s3 + $0x28] sm:$0xff]   ;;  %v1763_v48 = vld [vmem:[%s2068_s0 + $0x10] sm:$0xff]  }
   0x9   :  { %v1758_v47 = vld [vmem:[%s2068_s0 + $0x8] sm:$0xff]   ;;  %v1770_v49 = vld [vmem:[%s2068_s0 + $0x18] sm:$0xff]   ;;  %v1775_v50 = vld [vmem:[%s2068_s0 + $0x20] sm:$0xff]  }
   0xa   :  { %v1782_v51 = vld [vmem:[%s2068_s0 + $0x28] sm:$0xff]   ;;  %v1787_v52 = vld [vmem:[%s2068_s0 + $0x30] sm:$0xff]   ;;  %v1794_v53 = vld [vmem:[%s2068_s0 + $0x38] sm:$0xff]  }
   0xb   :  { %1357 = vmatpush3.bf16.msra.mxu0 %v1546_v2  ;;  %v1574_v54 = vld [vmem:[%s2069_s3 + $0x30] sm:$0xff]   ;;  %v1575_v55 = vld [vmem:[%s2069_s3 + $0x38] sm:$0xff]  }
   0xc   :  { %1358 = vmatprep.subr.bf16.mxu0 %v1547_v3 }
   0xf   :  { %1359 = vmatpush3.bf16.msra.mxu0 %v1547_v3 }
  0x10   :  { %1360 = vmatprep.subr.bf16.mxu0 %v1548_v5 }
  0x13   :  { %1361 = vmatpush3.bf16.msra.mxu0 %v1548_v5 }
  0x14   :  { %1362 = vmatprep.subr.bf16.mxu0 %v1549_v6 }
  0x17   :  { %1363 = vmatpush3.bf16.msra.mxu0 %v1549_v6 }
  0x18   :  { %1364 = vmatprep.subr.bf16.mxu0 %v1550_v7 }
  0x1b   :  { %1365 = vmatpush3.bf16.msra.mxu0 %v1550_v7 }
  0x1c   :  { %1366 = vmatprep.subr.bf16.mxu0 %v1551_v8 }
  0x1f   :  { %1367 = vmatpush3.bf16.msra.mxu0 %v1551_v8 }
  0x20   :  { %1416 = vmatprep.subr.bf16.mxu0 %v1568_v17 }
  0x22   :  { %1369 = vmatmul.mubr.bf16.vlgmr.msra.gmra.mrb[0].mxu0 %v1553_v9 }
  0x23   :  { %1372 = vmatprep.mubr.bf16.mxu0 %v1554_v10  ;;  %1417 = vmatpush3.bf16.msra.mxu0 %v1568_v17 }
  0x24   :  { %1418 = vmatprep.subr.bf16.mxu0 %v1569_v18 }
  0x27   :  { %1419 = vmatpush3.bf16.msra.mxu0 %v1569_v18 }
  0x28   :  { %1420 = vmatprep.subr.bf16.mxu0 %v1570_v19 }
  0x2a   :  { %1373 = vmatmul.mubr.bf16.gmra.mrb[4].mxu0 %v1555_v11 }
  0x2b   :  { %1376 = vmatprep.mubr.bf16.mxu0 %v1556_v12  ;;  %1421 = vmatpush3.bf16.msra.mxu0 %v1570_v19 }
  0x2c   :  { %1422 = vmatprep.subr.bf16.mxu0 %v1571_v20 }
  0x2f   :  { %1423 = vmatpush3.bf16.msra.mxu0 %v1571_v20 }
  0x30   :  { %1424 = vmatprep.subr.bf16.mxu0 %v1572_v21 }
  0x32   :  { %1377 = vmatmul.mubr.bf16.gmra.mrb[8].mxu0 %v1557_v13 }
  0x33   :  { %1380 = vmatprep.mubr.bf16.mxu0 %v1558_v14  ;;  %1425 = vmatpush3.bf16.msra.mxu0 %v1572_v21 }
  0x34   :  { %1426 = vmatprep.subr.bf16.mxu0 %v1573_v22 }
  0x37   :  { %1427 = vmatpush3.bf16.msra.mxu0 %v1573_v22 }
  0x38   :  { %1428 = vmatprep.subr.bf16.mxu0 %v1574_v54 }
  0x3a   :  { %1381 = vmatmul.mubr.bf16.gmra.mrb[12].mxu0 %v1559_v15 }
  0x3b   :  { %1429 = vmatpush3.bf16.msra.mxu0 %v1574_v54 }
  0x3c   :  { %1430 = vmatprep.subr.bf16.mxu0 %v1575_v55 }
  0x3f   :  { %1431 = vmatpush3.bf16.msra.mxu0 %v1575_v55 }
  0xf5   :  { %v1370_v23 = vpop.f32.mrb[0].mxu0 }
  0xf6   :  { %v201_v24 = vpop.f32.mrb[1].mxu0 }
  0xf7   :  { %v1371_v25 = vpop.f32.mrb[2].mxu0 }
  0xf8   :  { %v265_v26 = vpack.c.bf16 %v1371_v25, %v1370_v23  ;;  %v204_v27 = vpop.f32.mrb[3].mxu0 }
  0xf9   :  { %v264_v28 = vpack.c.bf16 %v204_v27, %v201_v24 }
  0xfb   :  { %1384 = vmatprep.subr.bf16.mxu1 %v264_v28 }
  0xfc   :  { %1385 = vmatpush3.bf16.msra.mxu1 %v264_v28 }
  0xfd   :  { %v1374_v29 = vpop.f32.mrb[4].mxu0  ;;  %1386 = vmatprep.subr.bf16.mxu1 %v265_v26 }
  0xfe   :  { %v217_v30 = vpop.f32.mrb[5].mxu0 }
  0xff   :  { %v1375_v31 = vpop.f32.mrb[6].mxu0 }
 0x100   :  { %v267_v32 = vpack.c.bf16 %v1375_v31, %v1374_v29  ;;  %v220_v33 = vpop.f32.mrb[7].mxu0  ;;  %1387 = vmatpush3.bf16.msra.mxu1 %v265_v26 }
 0x101   :  { %v266_v34 = vpack.c.bf16 %v220_v33, %v217_v30  ;;  %v1576_v33 = vld [vmem:[%s2070_s4] sm:$0xff]  }
 0x102   :  { %1480 = vmatprep.subr.bf16.mxu0 %v1576_v33 }
 0x103   :  { %1388 = vmatprep.subr.bf16.mxu1 %v266_v34 }
 0x104   :  { %1389 = vmatpush3.bf16.msra.mxu1 %v266_v34  ;;  %v1577_v34 = vld [vmem:[%s2070_s4 + $0x8] sm:$0xff]  }
 0x105   :  { %v1378_v35 = vpop.f32.mrb[8].mxu0  ;;  %1390 = vmatprep.subr.bf16.mxu1 %v267_v32 }
 0x106   :  { %v233_v36 = vpop.f32.mrb[9].mxu0 }
 0x107   :  { %v1379_v37 = vpop.f32.mrb[10].mxu0 }
 0x108   :  { %v269_v38 = vpack.c.bf16 %v1379_v37, %v1378_v35  ;;  %v236_v39 = vpop.f32.mrb[11].mxu0  ;;  %1391 = vmatpush3.bf16.msra.mxu1 %v267_v32  ;;  %v1578_v35 = vld [vmem:[%s2070_s4 + $0x10] sm:$0xff]   ;;  %v1580_v37 = vld [vmem:[%s2070_s4 + $0x20] sm:$0xff]  }
 0x109   :  { %v268_v40 = vpack.c.bf16 %v236_v39, %v233_v36  ;;  %v1579_v36 = vld [vmem:[%s2070_s4 + $0x18] sm:$0xff]  }
 0x10b   :  { %1392 = vmatprep.subr.bf16.mxu1 %v268_v40 }
 0x10c   :  { %1393 = vmatpush3.bf16.msra.mxu1 %v268_v40 }
 0x10d   :  { %v1382_v41 = vpop.f32.mrb[12].mxu0  ;;  %1394 = vmatprep.subr.bf16.mxu1 %v269_v38 }
 0x10e   :  { %v249_v42 = vpop.f32.mrb[13].mxu0 }
 0x10f   :  { %v1383_v43 = vpop.f32.mrb[14].mxu0 }
 0x110   :  { %v271_v44 = vpack.c.bf16 %v1383_v43, %v1382_v41  ;;  %v252_v45 = vpop.f32.mrb[15].mxu0  ;;  %1395 = vmatpush3.bf16.msra.mxu1 %v269_v38  ;;  %v1581_v38 = vld [vmem:[%s2070_s4 + $0x28] sm:$0xff]  }
 0x111   :  { %v270_v46 = vpack.c.bf16 %v252_v45, %v249_v42 }
 0x113   :  { %1396 = vmatprep.subr.bf16.mxu1 %v270_v46 }
 0x114   :  { %1397 = vmatpush3.bf16.msra.mxu1 %v270_v46 }
 0x115   :  { %1398 = vmatprep.subr.bf16.mxu1 %v271_v44 }
 0x118   :  { %1399 = vmatpush3.bf16.msra.mxu1 %v271_v44 }
 0x11b   :  { %1401 = vmatmul.mubr.bf16.vlgmr.msra.gmra.mrb[0].mxu1 %v1758_v47 }
 0x11c   :  { %1404 = vmatprep.mubr.bf16.mxu1 %v1763_v48 }
 0x123   :  { %1405 = vmatmul.mubr.bf16.gmra.mrb[4].mxu1 %v1770_v49 }
 0x124   :  { %1408 = vmatprep.mubr.bf16.mxu1 %v1775_v50 }
 0x12b   :  { %1409 = vmatmul.mubr.bf16.gmra.mrb[8].mxu1 %v1782_v51 }
 0x12c   :  { %1412 = vmatprep.mubr.bf16.mxu1 %v1787_v52 }
 0x133   :  { %1413 = vmatmul.mubr.bf16.gmra.mrb[12].mxu1 %v1794_v53 }
 0x134   :  { %1464 = vmatprep.mubr.bf16.mxu1 %v1734_v16 }
 0x1ee   :  { %v1402_v56 = vpop.f32.mrb[0].mxu1 }
 0x1ef   :  { %v354_v57 = vpop.f32.mrb[1].mxu1  ;;  %v419_v59 = vmax.f32 %v1402_v56, 0.0 }
 0x1f0   :  { %v1403_v58 = vpop.f32.mrb[2].mxu1  ;;  %v417_v62 = vmax.f32 %v354_v57, 0.0 }
 0x1f1   :  { %v420_v60 = vmax.f32 %v1403_v58, 0.0  ;;  %v357_v61 = vpop.f32.mrb[3].mxu1 }
 0x1f2   :  { %v418_v63 = vmax.f32 %v357_v61, 0.0 }
 0x1f3   :  { %v434_v0 = vpack.c.bf16 %v420_v60, %v419_v59 }
 0x1f4   :  { %v433_v1 = vpack.c.bf16 %v418_v63, %v417_v62 }
 0x1f6   :  { %v1406_v2 = vpop.f32.mrb[4].mxu1  ;;  %1432 = vmatprep.mubr.bf16.mxu0 %v433_v1 }
 0x1f7   :  { %v370_v3 = vpop.f32.mrb[5].mxu1  ;;  %1433 = vmatmul.mubr.bf16.vlgmr.msra.gmra.mrb[16].mxu0 %v434_v0  ;;  %v423_v5 = vmax.f32 %v1406_v2, 0.0 }
 0x1f8   :  { %v1407_v4 = vpop.f32.mrb[6].mxu1  ;;  %v421_v8 = vmax.f32 %v370_v3, 0.0  ;;  %1481 = vmatpush3.bf16.msra.mxu0 %v1576_v33 }
 0x1f9   :  { %v424_v6 = vmax.f32 %v1407_v4, 0.0  ;;  %v373_v7 = vpop.f32.mrb[7].mxu1  ;;  %1482 = vmatprep.subr.bf16.mxu0 %v1577_v34 }
 0x1fa   :  { %v422_v9 = vmax.f32 %v373_v7, 0.0  ;;  %v1583_v7 = vld [vmem:[%s2070_s4 + $0x38] sm:$0xff]  }
 0x1fb   :  { %v436_v10 = vpack.c.bf16 %v424_v6, %v423_v5  ;;  %v1582_v6 = vld [vmem:[%s2070_s4 + $0x30] sm:$0xff]  }
 0x1fc   :  { %v435_v11 = vpack.c.bf16 %v422_v9, %v421_v8  ;;  %1483 = vmatpush3.bf16.msra.mxu0 %v1577_v34 }
 0x1fd   :  { %1484 = vmatprep.subr.bf16.mxu0 %v1578_v35 }
 0x1fe   :  { %v1410_v12 = vpop.f32.mrb[8].mxu1  ;;  %1436 = vmatprep.mubr.bf16.mxu0 %v435_v11 }
 0x1ff   :  { %v386_v13 = vpop.f32.mrb[9].mxu1  ;;  %1437 = vmatmul.mubr.bf16.gmra.mrb[20].mxu0 %v436_v10  ;;  %v427_v15 = vmax.f32 %v1410_v12, 0.0 }
 0x200   :  { %v1411_v14 = vpop.f32.mrb[10].mxu1  ;;  %v425_v19 = vmax.f32 %v386_v13, 0.0  ;;  %1485 = vmatpush3.bf16.msra.mxu0 %v1578_v35 }
 0x201   :  { %v428_v17 = vmax.f32 %v1411_v14, 0.0  ;;  %v389_v18 = vpop.f32.mrb[11].mxu1  ;;  %1486 = vmatprep.subr.bf16.mxu0 %v1579_v36 }
 0x202   :  { %v426_v20 = vmax.f32 %v389_v18, 0.0 }
 0x203   :  { %v438_v21 = vpack.c.bf16 %v428_v17, %v427_v15 }
 0x204   :  { %v437_v22 = vpack.c.bf16 %v426_v20, %v425_v19  ;;  %1487 = vmatpush3.bf16.msra.mxu0 %v1579_v36 }
 0x205   :  { %1488 = vmatprep.subr.bf16.mxu0 %v1580_v37 }
 0x206   :  { %v1414_v23 = vpop.f32.mrb[12].mxu1  ;;  %1440 = vmatprep.mubr.bf16.mxu0 %v437_v22 }
 0x207   :  { %v402_v24 = vpop.f32.mrb[13].mxu1  ;;  %1441 = vmatmul.mubr.bf16.gmra.mrb[24].mxu0 %v438_v21  ;;  %v431_v26 = vmax.f32 %v1414_v23, 0.0 }
 0x208   :  { %v1415_v25 = vpop.f32.mrb[14].mxu1  ;;  %v429_v29 = vmax.f32 %v402_v24, 0.0  ;;  %1489 = vmatpush3.bf16.msra.mxu0 %v1580_v37 }
 0x209   :  { %v432_v27 = vmax.f32 %v1415_v25, 0.0  ;;  %v405_v28 = vpop.f32.mrb[15].mxu1  ;;  %1490 = vmatprep.subr.bf16.mxu0 %v1581_v38 }
 0x20a   :  { %v430_v30 = vmax.f32 %v405_v28, 0.0 }
 0x20b   :  { %v440_v31 = vpack.c.bf16 %v432_v27, %v431_v26 }
 0x20c   :  { %v439_v32 = vpack.c.bf16 %v430_v30, %v429_v29  ;;  %1491 = vmatpush3.bf16.msra.mxu0 %v1581_v38 }
 0x20d   :  { %1492 = vmatprep.subr.bf16.mxu0 %v1582_v6 }
 0x20e   :  { %1444 = vmatprep.mubr.bf16.mxu0 %v439_v32 }
 0x20f   :  { %1445 = vmatmul.mubr.bf16.gmra.mrb[28].mxu0 %v440_v31 }
 0x210   :  { %1493 = vmatpush3.bf16.msra.mxu0 %v1582_v6 }
 0x211   :  { %1494 = vmatprep.subr.bf16.mxu0 %v1583_v7 }
 0x214   :  { %1495 = vmatpush3.bf16.msra.mxu0 %v1583_v7 }
 0x2ca   :  { %v1434_v39 = vpop.f32.mrb[16].mxu0 }
 0x2cb   :  { %v539_v40 = vpop.f32.mrb[17].mxu0 }
 0x2cc   :  { %v1435_v41 = vpop.f32.mrb[18].mxu0 }
 0x2cd   :  { %v603_v42 = vpack.c.bf16 %v1435_v41, %v1434_v39  ;;  %v542_v43 = vpop.f32.mrb[19].mxu0 }
 0x2ce   :  { %v602_v44 = vpack.c.bf16 %v542_v43, %v539_v40 }
 0x2d0   :  { %1448 = vmatprep.subr.bf16.mxu1 %v602_v44 }
 0x2d1   :  { %1449 = vmatpush3.bf16.msra.mxu1 %v602_v44 }
 0x2d2   :  { %v1438_v45 = vpop.f32.mrb[20].mxu0  ;;  %1450 = vmatprep.subr.bf16.mxu1 %v603_v42 }
 0x2d3   :  { %v555_v46 = vpop.f32.mrb[21].mxu0 }
 0x2d4   :  { %v1439_v54 = vpop.f32.mrb[22].mxu0 }
 0x2d5   :  { %v605_v55 = vpack.c.bf16 %v1439_v54, %v1438_v45  ;;  %v558_v56 = vpop.f32.mrb[23].mxu0  ;;  %1451 = vmatpush3.bf16.msra.mxu1 %v603_v42 }
 0x2d6   :  { %v604_v57 = vpack.c.bf16 %v558_v56, %v555_v46 }
 0x2d8   :  { %1452 = vmatprep.subr.bf16.mxu1 %v604_v57 }
 0x2d9   :  { %1453 = vmatpush3.bf16.msra.mxu1 %v604_v57 }
 0x2da   :  { %v1442_v58 = vpop.f32.mrb[24].mxu0  ;;  %1454 = vmatprep.subr.bf16.mxu1 %v605_v55 }
 0x2db   :  { %v571_v59 = vpop.f32.mrb[25].mxu0 }
 0x2dc   :  { %v1443_v60 = vpop.f32.mrb[26].mxu0 }
 0x2dd   :  { %v607_v61 = vpack.c.bf16 %v1443_v60, %v1442_v58  ;;  %v574_v62 = vpop.f32.mrb[27].mxu0  ;;  %1455 = vmatpush3.bf16.msra.mxu1 %v605_v55 }
 0x2de   :  { %v606_v63 = vpack.c.bf16 %v574_v62, %v571_v59 }
 0x2e0   :  { %1456 = vmatprep.subr.bf16.mxu1 %v606_v63 }
 0x2e1   :  { %1457 = vmatpush3.bf16.msra.mxu1 %v606_v63 }
 0x2e2   :  { %v1446_v0 = vpop.f32.mrb[28].mxu0  ;;  %1458 = vmatprep.subr.bf16.mxu1 %v607_v61 }
 0x2e3   :  { %v587_v1 = vpop.f32.mrb[29].mxu0 }
 0x2e4   :  { %v1447_v2 = vpop.f32.mrb[30].mxu0 }
 0x2e5   :  { %v609_v3 = vpack.c.bf16 %v1447_v2, %v1446_v0  ;;  %v590_v4 = vpop.f32.mrb[31].mxu0  ;;  %1459 = vmatpush3.bf16.msra.mxu1 %v607_v61 }
 0x2e6   :  { %v608_v5 = vpack.c.bf16 %v590_v4, %v587_v1 }
 0x2e8   :  { %1460 = vmatprep.subr.bf16.mxu1 %v608_v5 }
 0x2e9   :  { %1461 = vmatpush3.bf16.msra.mxu1 %v608_v5 }
 0x2ea   :  { %1462 = vmatprep.subr.bf16.mxu1 %v609_v3 }
 0x2ed   :  { %1463 = vmatpush3.bf16.msra.mxu1 %v609_v3 }
 0x2f0   :  { %1465 = vmatmul.mubr.bf16.vlgmr.msra.gmra.mrb[16].mxu1 %v1758_v47 }
 0x2f1   :  { %1468 = vmatprep.mubr.bf16.mxu1 %v1763_v48 }
 0x2f8   :  { %1469 = vmatmul.mubr.bf16.gmra.mrb[20].mxu1 %v1770_v49 }
 0x2f9   :  { %1472 = vmatprep.mubr.bf16.mxu1 %v1775_v50 }
 0x300   :  { %1473 = vmatmul.mubr.bf16.gmra.mrb[24].mxu1 %v1782_v51 }
 0x301   :  { %1476 = vmatprep.mubr.bf16.mxu1 %v1787_v52 }
 0x308   :  { %1477 = vmatmul.mubr.bf16.gmra.mrb[28].mxu1 %v1794_v53 }
 0x309   :  { %1528 = vmatprep.mubr.bf16.mxu1 %v1734_v16 }
 0x3c3   :  { %v1466_v8 = vpop.f32.mrb[16].mxu1 }
 0x3c4   :  { %v644_v9 = vpop.f32.mrb[17].mxu1  ;;  %v709_v11 = vmax.f32 %v1466_v8, 0.0 }
 0x3c5   :  { %v1467_v10 = vpop.f32.mrb[18].mxu1  ;;  %v707_v14 = vmax.f32 %v644_v9, 0.0 }
 0x3c6   :  { %v710_v12 = vmax.f32 %v1467_v10, 0.0  ;;  %v647_v13 = vpop.f32.mrb[19].mxu1 }
 0x3c7   :  { %v708_v16 = vmax.f32 %v647_v13, 0.0 }
 0x3c8   :  { %v724_v15 = vpack.c.bf16 %v710_v12, %v709_v11 }
 0x3c9   :  { %v723_v17 = vpack.c.bf16 %v708_v16, %v707_v14  ;;  %v1013_v16 = vlaneseq }
 0x3cb   :  { %v1470_v18 = vpop.f32.mrb[20].mxu1  ;;  %1496 = vmatprep.mubr.bf16.mxu0 %v723_v17 }
 0x3cc   :  { %v660_v19 = vpop.f32.mrb[21].mxu1  ;;  %1497 = vmatmul.mubr.bf16.vlgmr.msra.gmra.mrb[32].mxu0 %v724_v15  ;;  %v713_v21 = vmax.f32 %v1470_v18, 0.0  ;;  %v1843_v15 = vand.u32 127, %v1013_v16 }
 0x3cd   :  { %v1471_v20 = vpop.f32.mrb[22].mxu1  ;;  %v711_v24 = vmax.f32 %v660_v19, 0.0 }
 0x3ce   :  { %v714_v22 = vmax.f32 %v1471_v20, 0.0  ;;  %v663_v23 = vpop.f32.mrb[23].mxu1  ;;  %vm1015_vm0 = vcmp.lt.s32.totalorder %v1843_v15, 7 }
 0x3cf   :  { %v712_v25 = vmax.f32 %v663_v23, 0.0 }
 0x3d0   :  { %v726_v26 = vpack.c.bf16 %v714_v22, %v713_v21 }
 0x3d1   :  { %v725_v27 = vpack.c.bf16 %v712_v25, %v711_v24 }
 0x3d3   :  { %v1474_v28 = vpop.f32.mrb[24].mxu1  ;;  %1500 = vmatprep.mubr.bf16.mxu0 %v725_v27 }
 0x3d4   :  { %v676_v29 = vpop.f32.mrb[25].mxu1  ;;  %1501 = vmatmul.mubr.bf16.gmra.mrb[36].mxu0 %v726_v26  ;;  %v717_v31 = vmax.f32 %v1474_v28, 0.0 }
 0x3d5   :  { %v1475_v30 = vpop.f32.mrb[26].mxu1  ;;  %v715_v34 = vmax.f32 %v676_v29, 0.0 }
 0x3d6   :  { %v718_v32 = vmax.f32 %v1475_v30, 0.0  ;;  %v679_v33 = vpop.f32.mrb[27].mxu1 }
 0x3d7   :  { %v716_v35 = vmax.f32 %v679_v33, 0.0 }
 0x3d8   :  { %v728_v36 = vpack.c.bf16 %v718_v32, %v717_v31 }
 0x3d9   :  { %v727_v37 = vpack.c.bf16 %v716_v35, %v715_v34 }
 0x3db   :  { %v1478_v38 = vpop.f32.mrb[28].mxu1  ;;  %1504 = vmatprep.mubr.bf16.mxu0 %v727_v37 }
 0x3dc   :  { %v692_v39 = vpop.f32.mrb[29].mxu1  ;;  %1505 = vmatmul.mubr.bf16.gmra.mrb[40].mxu0 %v728_v36  ;;  %v721_v41 = vmax.f32 %v1478_v38, 0.0 }
 0x3dd   :  { %v1479_v40 = vpop.f32.mrb[30].mxu1  ;;  %v719_v44 = vmax.f32 %v692_v39, 0.0 }
 0x3de   :  { %v722_v42 = vmax.f32 %v1479_v40, 0.0  ;;  %v695_v43 = vpop.f32.mrb[31].mxu1 }
 0x3df   :  { %v720_v45 = vmax.f32 %v695_v43, 0.0 }
 0x3e0   :  { %v730_v46 = vpack.c.bf16 %v722_v42, %v721_v41 }
 0x3e1   :  { %v729_v54 = vpack.c.bf16 %v720_v45, %v719_v44 }
 0x3e3   :  { %1508 = vmatprep.mubr.bf16.mxu0 %v729_v54 }
 0x3e4   :  { %1509 = vmatmul.mubr.bf16.gmra.mrb[44].mxu0 %v730_v46 }
 0x49f   :  { %v1498_v55 = vpop.f32.mrb[32].mxu0 }
 0x4a0   :  { %v829_v56 = vpop.f32.mrb[33].mxu0 }
 0x4a1   :  { %v1499_v57 = vpop.f32.mrb[34].mxu0 }
 0x4a2   :  { %v893_v58 = vpack.c.bf16 %v1499_v57, %v1498_v55  ;;  %v832_v59 = vpop.f32.mrb[35].mxu0 }
 0x4a3   :  { %v892_v60 = vpack.c.bf16 %v832_v59, %v829_v56 }
 0x4a5   :  { %1512 = vmatprep.subr.bf16.mxu1 %v892_v60 }
 0x4a6   :  { %1513 = vmatpush3.bf16.msra.mxu1 %v892_v60 }
 0x4a7   :  { %v1502_v61 = vpop.f32.mrb[36].mxu0  ;;  %1514 = vmatprep.subr.bf16.mxu1 %v893_v58 }
 0x4a8   :  { %v845_v62 = vpop.f32.mrb[37].mxu0 }
 0x4a9   :  { %v1503_v63 = vpop.f32.mrb[38].mxu0 }
 0x4aa   :  { %v895_v0 = vpack.c.bf16 %v1503_v63, %v1502_v61  ;;  %v848_v1 = vpop.f32.mrb[39].mxu0  ;;  %1515 = vmatpush3.bf16.msra.mxu1 %v893_v58 }
 0x4ab   :  { %v894_v2 = vpack.c.bf16 %v848_v1, %v845_v62 }
 0x4ad   :  { %1516 = vmatprep.subr.bf16.mxu1 %v894_v2 }
 0x4ae   :  { %1517 = vmatpush3.bf16.msra.mxu1 %v894_v2 }
 0x4af   :  { %v1506_v3 = vpop.f32.mrb[40].mxu0  ;;  %1518 = vmatprep.subr.bf16.mxu1 %v895_v0 }
 0x4b0   :  { %v861_v4 = vpop.f32.mrb[41].mxu0 }
 0x4b1   :  { %v1507_v5 = vpop.f32.mrb[42].mxu0 }
 0x4b2   :  { %v897_v6 = vpack.c.bf16 %v1507_v5, %v1506_v3  ;;  %v864_v7 = vpop.f32.mrb[43].mxu0  ;;  %1519 = vmatpush3.bf16.msra.mxu1 %v895_v0 }
 0x4b3   :  { %v896_v8 = vpack.c.bf16 %v864_v7, %v861_v4 }
 0x4b5   :  { %1520 = vmatprep.subr.bf16.mxu1 %v896_v8 }
 0x4b6   :  { %1521 = vmatpush3.bf16.msra.mxu1 %v896_v8 }
 0x4b7   :  { %v1510_v9 = vpop.f32.mrb[44].mxu0  ;;  %1522 = vmatprep.subr.bf16.mxu1 %v897_v6 }
 0x4b8   :  { %v877_v10 = vpop.f32.mrb[45].mxu0 }
 0x4b9   :  { %v1511_v11 = vpop.f32.mrb[46].mxu0 }
 0x4ba   :  { %v899_v12 = vpack.c.bf16 %v1511_v11, %v1510_v9  ;;  %v880_v13 = vpop.f32.mrb[47].mxu0  ;;  %1523 = vmatpush3.bf16.msra.mxu1 %v897_v6 }
 0x4bb   :  { %v898_v14 = vpack.c.bf16 %v880_v13, %v877_v10 }
 0x4bd   :  { %1524 = vmatprep.subr.bf16.mxu1 %v898_v14 }
 0x4be   :  { %1525 = vmatpush3.bf16.msra.mxu1 %v898_v14 }
 0x4bf   :  { %1526 = vmatprep.subr.bf16.mxu1 %v899_v12 }
 0x4c2   :  { %1527 = vmatpush3.bf16.msra.mxu1 %v899_v12 }
 0x4c5   :  { %1529 = vmatmul.mubr.bf16.vlgmr.msra.gmra.mrb[32].mxu1 %v1758_v47 }
 0x4c6   :  { %1532 = vmatprep.mubr.bf16.mxu1 %v1763_v48 }
 0x4cd   :  { %1533 = vmatmul.mubr.bf16.gmra.mrb[36].mxu1 %v1770_v49 }
 0x4ce   :  { %1536 = vmatprep.mubr.bf16.mxu1 %v1775_v50 }
 0x4d5   :  { %1537 = vmatmul.mubr.bf16.gmra.mrb[40].mxu1 %v1782_v51 }
 0x4d6   :  { %1540 = vmatprep.mubr.bf16.mxu1 %v1787_v52 }
 0x4dd   :  { %1541 = vmatmul.mubr.bf16.gmra.mrb[44].mxu1 %v1794_v53 }
 0x598   :  { %v1530_v17 = vpop.f32.mrb[32].mxu1 }
 0x599   :  { %999 = vst [vmem:[%s2071_s6 + $0x10] sm:$0xff] %v1530_v17  ;;  %v934_v47 = vpop.f32.mrb[33].mxu1  ;;  %v1018_v48 = vsel %vm1015_vm0, %v1530_v17, -1e+30 }
 0x59a   :  { %997 = vst [vmem:[%s2071_s6] sm:$0xff] %v934_v47  ;;  %1036 = vmax.xlane.f32.xlu1 %v1018_v48  ;;  %v1531_v49 = vpop.f32.mrb[34].mxu1  ;;  %v1016_v50 = vsel %vm1015_vm0, %v934_v47, -1e+30 }
 0x59b   :  { %1000 = vst [vmem:[%s2071_s6 + $0x18] sm:$0xff] %v1531_v49  ;;  %1032 = vmax.xlane.f32.xlu0 %v1016_v50  ;;  %v937_v51 = vpop.f32.mrb[35].mxu1  ;;  %v1019_v52 = vsel %vm1015_vm0, %v1531_v49, -1e+30 }
 0x59c   :  { %998 = vst [vmem:[%s2071_s6 + $0x8] sm:$0xff] %v937_v51  ;;  %v1017_v53 = vsel %vm1015_vm0, %v937_v51, -1e+30 }
 0x59e   :  { %1038 = vmax.xlane.f32.xlu1 %v1019_v52 }
 0x59f   :  { %1034 = vmax.xlane.f32.xlu0 %v1017_v53 }
 0x5a0   :  { %v1534_v18 = vpop.f32.mrb[36].mxu1 }
 0x5a1   :  { %1003 = vst [vmem:[%s2071_s6 + $0x30] sm:$0xff] %v1534_v18  ;;  %v950_v19 = vpop.f32.mrb[37].mxu1  ;;  %v1022_v20 = vsel %vm1015_vm0, %v1534_v18, -1e+30 }
 0x5a2   :  { %1001 = vst [vmem:[%s2071_s6 + $0x20] sm:$0xff] %v950_v19  ;;  %v1535_v21 = vpop.f32.mrb[38].mxu1  ;;  %v1020_v24 = vsel %vm1015_vm0, %v950_v19, -1e+30 }
 0x5a3   :  { %1004 = vst [vmem:[%s2071_s6 + $0x38] sm:$0xff] %v1535_v21  ;;  %1044 = vmax.xlane.f32.xlu0 %v1022_v20  ;;  %v953_v22 = vpop.f32.mrb[39].mxu1  ;;  %v1023_v23 = vsel %vm1015_vm0, %v1535_v21, -1e+30 }
 0x5a4   :  { %1002 = vst [vmem:[%s2071_s6 + $0x28] sm:$0xff] %v953_v22  ;;  %1046 = vmax.xlane.f32.xlu1 %v1023_v23  ;;  %v1021_v25 = vsel %vm1015_vm0, %v953_v22, -1e+30 }
 0x5a7   :  { %1040 = vmax.xlane.f32.xlu0 %v1020_v24 }
 0x5a8   :  { %1042 = vmax.xlane.f32.xlu1 %v1021_v25  ;;  %v1538_v26 = vpop.f32.mrb[40].mxu1 }
 0x5a9   :  { %1007 = vst [vmem:[%s2071_s6 + $0x50] sm:$0xff] %v1538_v26  ;;  %v966_v27 = vpop.f32.mrb[41].mxu1  ;;  %v1891_v28 = vsel %vm1015_vm0, %v1538_v26, -1e+30 }
 0x5aa   :  { %1005 = vst [vmem:[%s2071_s6 + $0x40] sm:$0xff] %v966_v27  ;;  %v1539_v29 = vpop.f32.mrb[42].mxu1  ;;  %v1907_v32 = vsel %vm1015_vm0, %v966_v27, -1e+30 }
 0x5ab   :  { %1008 = vst [vmem:[%s2071_s6 + $0x58] sm:$0xff] %v1539_v29  ;;  %1052 = vmax.xlane.f32.xlu0 %v1891_v28  ;;  %v969_v30 = vpop.f32.mrb[43].mxu1  ;;  %v1027_v31 = vsel %vm1015_vm0, %v1539_v29, -1e+30 }
 0x5ac   :  { %1006 = vst [vmem:[%s2071_s6 + $0x48] sm:$0xff] %v969_v30  ;;  %1054 = vmax.xlane.f32.xlu1 %v1027_v31  ;;  %v1912_v33 = vsel %vm1015_vm0, %v969_v30, -1e+30 }
 0x5af   :  { %1048 = vmax.xlane.f32.xlu0 %v1907_v32 }
 0x5b0   :  { %1050 = vmax.xlane.f32.xlu1 %v1912_v33  ;;  %v1542_v34 = vpop.f32.mrb[44].mxu1 }
 0x5b1   :  { %1011 = vst [vmem:[%s2071_s6 + $0x70] sm:$0xff] %v1542_v34  ;;  %v982_v35 = vpop.f32.mrb[45].mxu1  ;;  %v1939_v40 = vsel %vm1015_vm0, %v1542_v34, -1e+30 }
 0x5b2   :  { %1009 = vst [vmem:[%s2071_s6 + $0x60] sm:$0xff] %v982_v35  ;;  %v1543_v36 = vpop.f32.mrb[46].mxu1  ;;  %v1923_v37 = vsel %vm1015_vm0, %v982_v35, -1e+30 }
 0x5b3   :  { %1012 = vst [vmem:[%s2071_s6 + $0x78] sm:$0xff] %v1543_v36  ;;  %1056 = vmax.xlane.f32.xlu0 %v1923_v37  ;;  %v985_v38 = vpop.f32.mrb[47].mxu1  ;;  %v1944_v41 = vsel %vm1015_vm0, %v1543_v36, -1e+30 }
 0x5b4   :  { %1010 = vst [vmem:[%s2071_s6 + $0x68] sm:$0xff] %v985_v38  ;;  %v1934_v39 = vsel %vm1015_vm0, %v985_v38, -1e+30 }
 0x5b5   :  { %1058 = vmax.xlane.f32.xlu1 %v1934_v39 }
 0x5b7   :  { %1060 = vmax.xlane.f32.xlu0 %v1939_v40 }
 0x5b9   :  { %1062 = vmax.xlane.f32.xlu1 %v1944_v41 }
 0x627   :  { %v1037_v42 = vpop.xlane.xlu1 %1036 }
 0x628   :  { %v1947_v43 = vsub.f32 %v1018_v48, %v1037_v42  ;;  %v1033_v44 = vpop.xlane.xlu0 %1032 }
 0x629   :  { %v1949_v45 = vsub.f32 %v1016_v50, %v1033_v44 }
 0x62a   :  { %v1084_v46 = vmul.f32 1.442695, %v1947_v43 }
 0x62b   :  { %v1080_v54 = vmul.f32 1.442695, %v1949_v45  ;;  %v1039_v55 = vpop.xlane.xlu1 %1038 }
 0x62c   :  { %1584 = vpow2.f32 %v1084_v46  ;;  %v1953_v56 = vsub.f32 %v1019_v52, %v1039_v55  ;;  %v1035_v57 = vpop.xlane.xlu0 %1034 }
 0x62d   :  { %v1955_v58 = vsub.f32 %v1017_v53, %v1035_v57  ;;  %1586 = vpow2.f32 %v1080_v54 }
 0x62e   :  { %v1086_v59 = vmul.f32 1.442695, %v1953_v56 }
 0x62f   :  { %v1082_v60 = vmul.f32 1.442695, %v1955_v58 }
 0x630   :  { %1588 = vpow2.f32 %v1086_v59  ;;  %v1045_v61 = vpop.xlane.xlu0 %1044 }
 0x631   :  { %v1959_v62 = vsub.f32 %v1022_v20, %v1045_v61  ;;  %v1047_v63 = vpop.xlane.xlu1 %1046  ;;  %1590 = vpow2.f32 %v1082_v60 }
 0x632   :  { %v1961_v0 = vsub.f32 %v1023_v23, %v1047_v63 }
 0x633   :  { %v1092_v1 = vmul.f32 1.442695, %v1959_v62 }
 0x634   :  { %v1094_v2 = vmul.f32 1.442695, %v1961_v0  ;;  %v1041_v3 = vpop.xlane.xlu0 %1040 }
 0x635   :  { %1592 = vpow2.f32 %v1092_v1  ;;  %v1965_v4 = vsub.f32 %v1020_v24, %v1041_v3  ;;  %v1043_v5 = vpop.xlane.xlu1 %1042 }
 0x636   :  { %v1585_v6 = vpop.eup %1584  ;;  %v1967_v7 = vsub.f32 %v1021_v25, %v1043_v5  ;;  %1594 = vpow2.f32 %v1094_v2 }
 0x637   :  { %v1088_v8 = vmul.f32 1.442695, %v1965_v4  ;;  %1116 = vadd.xlane.f32.xlu0 %v1585_v6  ;;  %v1587_v11 = vpop.eup %1586 }
 0x638   :  { %v1090_v9 = vmul.f32 1.442695, %v1967_v7  ;;  %v1053_v10 = vpop.xlane.xlu0 %1052 }
 0x639   :  { %1596 = vpow2.f32 %v1088_v8  ;;  %v1972_v12 = vsub.f32 %v1891_v28, %v1053_v10  ;;  %v1055_v13 = vpop.xlane.xlu1 %1054 }
 0x63a   :  { %v1589_v14 = vpop.eup %1588  ;;  %v1974_v16 = vsub.f32 %v1027_v31, %v1055_v13  ;;  %1598 = vpow2.f32 %v1090_v9 }
 0x63b   :  { %v1100_v15 = vmul.f32 1.442695, %v1972_v12  ;;  %1112 = vadd.xlane.f32.xlu0 %v1587_v11  ;;  %1118 = vadd.xlane.f32.xlu1 %v1589_v14  ;;  %v1591_v50 = vpop.eup %1590 }
 0x63c   :  { %v1102_v17 = vmul.f32 1.442695, %v1974_v16  ;;  %v1049_v47 = vpop.xlane.xlu0 %1048 }
 0x63d   :  { %1600 = vpow2.f32 %v1100_v15  ;;  %v1979_v48 = vsub.f32 %v1907_v32, %v1049_v47  ;;  %v1051_v49 = vpop.xlane.xlu1 %1050 }
 0x63e   :  { %v1982_v51 = vsub.f32 %v1912_v33, %v1051_v49  ;;  %1602 = vpow2.f32 %v1102_v17 }
 0x63f   :  { %v1593_v52 = vpop.eup %1592  ;;  %v1096_v53 = vmul.f32 1.442695, %v1979_v48  ;;  %1114 = vadd.xlane.f32.xlu1 %v1591_v50 }
 0x640   :  { %v1098_v18 = vmul.f32 1.442695, %v1982_v51  ;;  %1124 = vadd.xlane.f32.xlu0 %v1593_v52  ;;  %v1057_v19 = vpop.xlane.xlu0 %1056  ;;  %v1595_v21 = vpop.eup %1594 }
 0x641   :  { %1604 = vpow2.f32 %v1096_v53  ;;  %v1987_v20 = vsub.f32 %v1923_v37, %v1057_v19 }
 0x642   :  { %v1059_v22 = vpop.xlane.xlu1 %1058  ;;  %1606 = vpow2.f32 %v1098_v18 }
 0x643   :  { %v1597_v23 = vpop.eup %1596  ;;  %v1104_v24 = vmul.f32 1.442695, %v1987_v20  ;;  %v1991_v25 = vsub.f32 %v1934_v39, %v1059_v22  ;;  %1126 = vadd.xlane.f32.xlu1 %v1595_v21 }
 0x644   :  { %1120 = vadd.xlane.f32.xlu0 %v1597_v23  ;;  %v1061_v26 = vpop.xlane.xlu0 %1060  ;;  %v1599_v29 = vpop.eup %1598 }
 0x645   :  { %1608 = vpow2.f32 %v1104_v24  ;;  %v1106_v27 = vmul.f32 1.442695, %v1991_v25  ;;  %v1995_v28 = vsub.f32 %v1939_v40, %v1061_v26 }
 0x646   :  { %v1063_v30 = vpop.xlane.xlu1 %1062 }
 0x647   :  { %v1601_v31 = vpop.eup %1600  ;;  %1610 = vpow2.f32 %v1106_v27  ;;  %v1108_v32 = vmul.f32 1.442695, %v1995_v28  ;;  %v1999_v33 = vsub.f32 %v1944_v41, %v1063_v30  ;;  %1122 = vadd.xlane.f32.xlu1 %v1599_v29 }
 0x648   :  { %1132 = vadd.xlane.f32.xlu0 %v1601_v31  ;;  %v1603_v35 = vpop.eup %1602 }
 0x649   :  { %1612 = vpow2.f32 %v1108_v32  ;;  %v1110_v34 = vmul.f32 1.442695, %v1999_v33 }
 0x64b   :  { %v1605_v36 = vpop.eup %1604  ;;  %1614 = vpow2.f32 %v1110_v34  ;;  %1134 = vadd.xlane.f32.xlu1 %v1603_v35 }
 0x64c   :  { %1128 = vadd.xlane.f32.xlu0 %v1605_v36  ;;  %v1607_v37 = vpop.eup %1606 }
 0x64f   :  { %v1609_v38 = vpop.eup %1608  ;;  %1130 = vadd.xlane.f32.xlu1 %v1607_v37 }
 0x650   :  { %1136 = vadd.xlane.f32.xlu0 %v1609_v38 }
 0x651   :  { %v1611_v39 = vpop.eup %1610 }
 0x653   :  { %v1613_v40 = vpop.eup %1612  ;;  %1138 = vadd.xlane.f32.xlu1 %v1611_v39 }
 0x654   :  { %1140 = vadd.xlane.f32.xlu0 %v1613_v40 }
 0x655   :  { %v1615_v41 = vpop.eup %1614 }
 0x657   :  { %1142 = vadd.xlane.f32.xlu1 %v1615_v41 }
 0x6c4   :  { %v1117_v42 = vpop.xlane.xlu0 %1116 }
 0x6c5   :  { %1616 = vlog2.f32 %v1117_v42 }
 0x6c8   :  { %v1113_v44 = vpop.xlane.xlu0 %1112  ;;  %v1119_v46 = vpop.xlane.xlu1 %1118 }
 0x6c9   :  { %1618 = vlog2.f32 %v1113_v44 }
 0x6ca   :  { %1620 = vlog2.f32 %v1119_v46 }
 0x6cc   :  { %v1115_v54 = vpop.xlane.xlu1 %1114 }
 0x6cd   :  { %1622 = vlog2.f32 %v1115_v54  ;;  %v1125_v55 = vpop.xlane.xlu0 %1124 }
 0x6ce   :  { %1624 = vlog2.f32 %v1125_v55 }
 0x6cf   :  { %v1617_v57 = vpop.eup %1616 }
 0x6d0   :  { %v1149_v59 = vmul.f32 0.6931472, %v1617_v57  ;;  %v1127_v60 = vpop.xlane.xlu1 %1126 }
 0x6d1   :  { %1626 = vlog2.f32 %v1127_v60  ;;  %v1121_v61 = vpop.xlane.xlu0 %1120 }
 0x6d2   :  { %v1178_v63 = vsub.f32 %v1947_v43, %v1149_v59  ;;  %1628 = vlog2.f32 %v1121_v61 }
 0x6d3   :  { %v1619_v1 = vpop.eup %1618 }
 0x6d4   :  { %v1621_v2 = vpop.eup %1620  ;;  %1194 = vst [vmem:[%s2072_s5 + $0x10] sm:$0xff] %v1178_v63  ;;  %v1145_v3 = vmul.f32 0.6931472, %v1619_v1  ;;  %v1123_v5 = vpop.xlane.xlu1 %1122 }
 0x6d5   :  { %v1151_v6 = vmul.f32 0.6931472, %v1621_v2  ;;  %1630 = vlog2.f32 %v1123_v5  ;;  %v1133_v8 = vpop.xlane.xlu0 %1132 }
 0x6d6   :  { %v1176_v9 = vsub.f32 %v1949_v45, %v1145_v3  ;;  %1632 = vlog2.f32 %v1133_v8 }
 0x6d7   :  { %v1623_v10 = vpop.eup %1622  ;;  %v1179_v11 = vsub.f32 %v1953_v56, %v1151_v6 }
 0x6d8   :  { %v1625_v13 = vpop.eup %1624  ;;  %1192 = vst [vmem:[%s2072_s5] sm:$0xff] %v1176_v9  ;;  %v1147_v43 = vmul.f32 0.6931472, %v1623_v10  ;;  %v1135_v14 = vpop.xlane.xlu1 %1134 }
 0x6d9   :  { %1195 = vst [vmem:[%s2072_s5 + $0x18] sm:$0xff] %v1179_v11  ;;  %v1157_v15 = vmul.f32 0.6931472, %v1625_v13  ;;  %1634 = vlog2.f32 %v1135_v14  ;;  %v1129_v17 = vpop.xlane.xlu0 %1128 }
 0x6da   :  { %v1177_v45 = vsub.f32 %v1955_v58, %v1147_v43  ;;  %1636 = vlog2.f32 %v1129_v17 }
 0x6db   :  { %v1627_v47 = vpop.eup %1626  ;;  %v1182_v56 = vsub.f32 %v1959_v62, %v1157_v15 }
 0x6dc   :  { %v1629_v49 = vpop.eup %1628  ;;  %1193 = vst [vmem:[%s2072_s5 + $0x8] sm:$0xff] %v1177_v45  ;;  %v1159_v50 = vmul.f32 0.6931472, %v1627_v47  ;;  %v1131_v52 = vpop.xlane.xlu1 %1130 }
 0x6dd   :  { %1198 = vst [vmem:[%s2072_s5 + $0x30] sm:$0xff] %v1182_v56  ;;  %v1153_v53 = vmul.f32 0.6931472, %v1629_v49  ;;  %1638 = vlog2.f32 %v1131_v52  ;;  %v1137_v18 = vpop.xlane.xlu0 %1136 }
 0x6de   :  { %v1183_v58 = vsub.f32 %v1961_v0, %v1159_v50  ;;  %1640 = vlog2.f32 %v1137_v18 }
 0x6df   :  { %v1631_v19 = vpop.eup %1630  ;;  %v1180_v62 = vsub.f32 %v1965_v4, %v1153_v53 }
 0x6e0   :  { %v1633_v21 = vpop.eup %1632  ;;  %1199 = vst [vmem:[%s2072_s5 + $0x38] sm:$0xff] %v1183_v58  ;;  %v1155_v22 = vmul.f32 0.6931472, %v1631_v19  ;;  %v1139_v23 = vpop.xlane.xlu1 %1138 }
 0x6e1   :  { %1196 = vst [vmem:[%s2072_s5 + $0x20] sm:$0xff] %v1180_v62  ;;  %v1165_v24 = vmul.f32 0.6931472, %v1633_v21  ;;  %1642 = vlog2.f32 %v1139_v23  ;;  %v1141_v26 = vpop.xlane.xlu0 %1140 }
 0x6e2   :  { %v1181_v0 = vsub.f32 %v1967_v7, %v1155_v22  ;;  %1644 = vlog2.f32 %v1141_v26 }
 0x6e3   :  { %v1635_v27 = vpop.eup %1634  ;;  %v1186_v4 = vsub.f32 %v1972_v12, %v1165_v24 }
 0x6e4   :  { %v1637_v29 = vpop.eup %1636  ;;  %1197 = vst [vmem:[%s2072_s5 + $0x28] sm:$0xff] %v1181_v0  ;;  %v1167_v30 = vmul.f32 0.6931472, %v1635_v27  ;;  %v1143_v31 = vpop.xlane.xlu1 %1142 }
 0x6e5   :  { %1202 = vst [vmem:[%s2072_s5 + $0x50] sm:$0xff] %v1186_v4  ;;  %v1161_v32 = vmul.f32 0.6931472, %v1637_v29  ;;  %1646 = vlog2.f32 %v1143_v31 }
 0x6e6   :  { %v1187_v34 = vsub.f32 %v1974_v16, %v1167_v30 }
 0x6e7   :  { %v1639_v7 = vpop.eup %1638  ;;  %v1184_v35 = vsub.f32 %v1979_v48, %v1161_v32 }
 0x6e8   :  { %v1641_v36 = vpop.eup %1640  ;;  %1203 = vst [vmem:[%s2072_s5 + $0x58] sm:$0xff] %v1187_v34  ;;  %v1163_v12 = vmul.f32 0.6931472, %v1639_v7 }
 0x6e9   :  { %1200 = vst [vmem:[%s2072_s5 + $0x40] sm:$0xff] %v1184_v35  ;;  %v1169_v37 = vmul.f32 0.6931472, %v1641_v36 }
 0x6ea   :  { %v1185_v38 = vsub.f32 %v1982_v51, %v1163_v12 }
 0x6eb   :  { %v1643_v39 = vpop.eup %1642  ;;  %v1188_v40 = vsub.f32 %v1987_v20, %v1169_v37 }
 0x6ec   :  { %v1645_v16 = vpop.eup %1644  ;;  %1201 = vst [vmem:[%s2072_s5 + $0x48] sm:$0xff] %v1185_v38  ;;  %v1171_v48 = vmul.f32 0.6931472, %v1643_v39 }
 0x6ed   :  { %1204 = vst [vmem:[%s2072_s5 + $0x60] sm:$0xff] %v1188_v40  ;;  %v1173_v41 = vmul.f32 0.6931472, %v1645_v16 }
 0x6ee   :  { %v1189_v42 = vsub.f32 %v1991_v25, %v1171_v48 }
 0x6ef   :  { %v1647_v44 = vpop.eup %1646  ;;  %v1190_v46 = vsub.f32 %v1995_v28, %v1173_v41 }
 0x6f0   :  { %1205 = vst [vmem:[%s2072_s5 + $0x68] sm:$0xff] %v1189_v42  ;;  %v1175_v51 = vmul.f32 0.6931472, %v1647_v44 }
 0x6f1   :  { %1206 = vst [vmem:[%s2072_s5 + $0x70] sm:$0xff] %v1190_v46 }
 0x6f2   :  { %v1191_v20 = vsub.f32 %v1999_v33, %v1175_v51 }
 0x6f4   :  { %1207 = vst [vmem:[%s2072_s5 + $0x78] sm:$0xff] %v1191_v20 }

</bundles_post_ra>
